<compile_context>
chip_gen: v6e
topology: v6e:2x2x1
jax: 0.10.0
libtpu: 0.0.40
codegen_flags: <defaults>
</compile_context>

<pallas_src>
import functools

import jax
import jax.numpy as jnp
from jax import lax
from jax.experimental import pallas as pl
from jax.experimental.pallas import tpu as pltpu


def _combined_loss_tile_kernel(qs_ref, ks_ref, qt_ref, kt_ref, out_ref,
                               *, inv_temp_student, inv_temp_teacher, num_keys):
    def normalized(ref, extra_scale=1.0):
        # torch.nn.functional.normalize(dim=-1, eps=1e-12):
        # rsqrt(max(||x||^2, 1e-24)) == 1 / max(||x||, 1e-12); norms in f32,
        # operand is cast back to the input dtype so bf16 inputs feed the MXU as bf16.
        x = ref[...]
        xf = x.astype(jnp.float32)
        ss = jnp.sum(xf * xf, axis=-1, keepdims=True)
        scale = lax.rsqrt(jnp.maximum(ss, 1e-24)) * extra_scale
        return (xf * scale).astype(x.dtype)

    # Fold 1/temp into the query scale: sim = (q_hat/temp) @ k_hat^T.
    qs_n = normalized(qs_ref, inv_temp_student)   # (TB, D)
    ks_n = normalized(ks_ref)                     # (N, D)
    qt_n = normalized(qt_ref, inv_temp_teacher)   # (TB, D)
    kt_n = normalized(kt_ref)                     # (N, D)

    # Contract the feature dim of both operands: (TB,D) x (N,D) -> (TB,N), no .T needed.
    dn = (((1,), (1,)), ((), ()))
    sim_s = lax.dot_general(qs_n, ks_n, dn, preferred_element_type=jnp.float32)
    sim_t = lax.dot_general(qt_n, kt_n, dn, preferred_element_type=jnp.float32)

    # Student log-softmax (row max reused for the argmax below).
    m_s = jnp.max(sim_s, axis=-1, keepdims=True)
    z_s = sim_s - m_s
    lse_s = jnp.log(jnp.sum(jnp.exp(z_s), axis=-1, keepdims=True))
    lp_s = z_s - lse_s

    # Teacher log-softmax; reuse exp(z_t) for the softmax probabilities.
    m_t = jnp.max(sim_t, axis=-1, keepdims=True)
    z_t = sim_t - m_t
    e_t = jnp.exp(z_t)
    s_t = jnp.sum(e_t, axis=-1, keepdims=True)
    lp_t = z_t - jnp.log(s_t)
    p_t = e_t * (1.0 / s_t)

    # First-index argmax (torch tie-break), reusing m_s / m_t.
    col = lax.broadcasted_iota(jnp.int32, sim_s.shape, 1)
    big = jnp.int32(num_keys)
    t_lab = jnp.min(jnp.where(sim_t == m_t, col, big), axis=-1, keepdims=True)
    s_lab = jnp.min(jnp.where(sim_s == m_s, col, big), axis=-1, keepdims=True)

    # Per-tile partial sums (divided by B and combined in the host epilogue).
    kl_sum = jnp.sum(p_t * (lp_t - lp_s))                    # kl_div(log_target=True) sum
    onehot = (col == t_lab).astype(jnp.float32)
    ce_sum = jnp.sum(-lp_s * onehot)                         # hard CE, summed over rows
    acc_sum = jnp.sum((s_lab == t_lab).astype(jnp.float32))  # argmax agreement count

    # Pack the three partials into one lane-dense (1, 8, 128) slab: lane0=kl, 1=ce, 2=acc.
    sub = lax.broadcasted_iota(jnp.int32, out_ref.shape, 1)
    lane = lax.broadcasted_iota(jnp.int32, out_ref.shape, 2)
    packed = jnp.where((sub == 0) & (lane == 0), kl_sum, 0.0)
    packed = jnp.where((sub == 0) & (lane == 1), ce_sum, packed)
    packed = jnp.where((sub == 0) & (lane == 2), acc_sum, packed)
    out_ref[...] = packed.astype(jnp.float32)


def _pick_batch_tile(b):
    # Prefer >=2 tiles (so both TensorCores get work on v7x) while keeping the MXU
    # row dim well filled; otherwise the largest (8,·)-aligned divisor; else full B.
    for cand in (512, 256, 128):
        if b % cand == 0 and b // cand >= 2:
            return cand
    for cand in (256, 128, 64, 32, 16, 8):
        if b % cand == 0:
            return cand
    return b


def combined_loss(queries_student, keys_student, queries_teacher, keys_teacher,
                  index=None, *, labda=0.5, temp_student=1.0, temp_teacher=1.0):
    # `index` is accepted for interface parity with the PyTorch module but is unused
    # by both KDNaiveLoss and CELoss forward passes.
    del index
    b, d = queries_student.shape
    n, _ = keys_student.shape

    tb = _pick_batch_tile(b)
    num_tiles = b // tb

    kernel = functools.partial(
        _combined_loss_tile_kernel,
        inv_temp_student=1.0 / float(temp_student),
        inv_temp_teacher=1.0 / float(temp_teacher),
        num_keys=n,
    )

    # Rough per-step VMEM estimate (double-buffered inputs + sim/logprob temporaries),
    # with headroom; capped so it stays within v7x's 64 MiB physical VMEM.
    itemsize = jnp.dtype(queries_student.dtype).itemsize
    est = 2 * 2 * (tb * d + n * d) * itemsize        # qs/qt/ks/kt, 2 buffers each
    est += 2 * 4 * (tb * n) * 4 + 2 * 8 * 128 * 4    # sims + softmax temps + out slab
    vmem_limit = int(min(max(4 * est, 32 << 20), 64 << 20))

    cost = pl.CostEstimate(
        flops=int(2 * 2 * b * n * d + 10 * b * n + 6 * (b + n) * d),
        transcendentals=int(2 * b * n + 4 * b + 2 * (b + num_tiles * n)),
        bytes_accessed=int(2 * (b + num_tiles * n) * d * itemsize
                           + num_tiles * 8 * 128 * 4),
    )

    partial = pl.pallas_call(
        kernel,
        out_shape=jax.ShapeDtypeStruct((num_tiles, 8, 128), jnp.float32),
        grid=(num_tiles,),
        in_specs=[
            pl.BlockSpec((tb, d), lambda i: (i, 0)),   # student queries (tiled over B)
            pl.BlockSpec((n, d), lambda i: (0, 0)),    # student keys (resident)
            pl.BlockSpec((tb, d), lambda i: (i, 0)),   # teacher queries (tiled over B)
            pl.BlockSpec((n, d), lambda i: (0, 0)),    # teacher keys (resident)
        ],
        out_specs=pl.BlockSpec((1, 8, 128), lambda i: (i, 0, 0)),
        compiler_params=pltpu.CompilerParams(
            dimension_semantics=("parallel",),         # batch tiles shard across TCs (v7x)
            vmem_limit_bytes=vmem_limit,
        ),
        cost_estimate=cost,
    )(queries_student, keys_student, queries_teacher, keys_teacher)

    # Tiny epilogue: reduce per-tile partial sums to the final scalars.
    sums = jnp.sum(partial[:, 0, :3], axis=0)
    b_f = jnp.float32(b)
    kl = sums[0] / b_f
    ce = sums[1] / b_f
    acc = sums[2] / b_f
    loss = labda * kl + (1.0 - labda) * ce
    return {"accuracy": acc, "loss": loss, "kl_loss": kl, "ce_loss": ce}


if __name__ == "__main__":
    key = jax.random.PRNGKey(0)
    k1, k2, k3, k4 = jax.random.split(key, 4)

    B, N, D = 8, 16, 32
    queries_student = jax.random.normal(k1, (B, D), dtype=jnp.float32)
    keys_student = jax.random.normal(k2, (N, D), dtype=jnp.float32)
    queries_teacher = jax.random.normal(k3, (B, D), dtype=jnp.float32)
    keys_teacher = jax.random.normal(k4, (N, D), dtype=jnp.float32)
    index = jnp.arange(B, dtype=jnp.int32)  # unused by the loss, kept for interface parity

    out = combined_loss(
        queries_student, keys_student, queries_teacher, keys_teacher, index,
        labda=0.3, temp_student=0.5, temp_teacher=0.1,
    )
    jax.block_until_ready(out)
    print("KERNEL_OK")
</pallas_src>

<mosaic_0001>
module attributes {stable_mosaic.version = 11 : i64} {
  func.func @_combined_loss_tile_kernel(%arg0: i32, %arg1: memref<8x32xf32, #tpu.memory_space<vmem>>, %arg2: memref<16x32xf32, #tpu.memory_space<vmem>>, %arg3: memref<8x32xf32, #tpu.memory_space<vmem>>, %arg4: memref<16x32xf32, #tpu.memory_space<vmem>>, %arg5: memref<1x8x128xf32, #tpu.memory_space<vmem>>) attributes {dimension_semantics = [#tpu.dimension_semantics<parallel>], iteration_bounds = array<i64: 1>, scalar_prefetch = 0 : i64, scratch_operands = 0 : i64, tpu.core_type = #tpu.core_type<tc>, window_params = [{transform_indices = @transform_0, window_bounds = array<i64: 8, 32>}, {pipeline_mode = #tpu.pipeline_mode<synchronous>, transform_indices = @transform_1, window_bounds = array<i64: 16, 32>}, {transform_indices = @transform_2, window_bounds = array<i64: 8, 32>}, {pipeline_mode = #tpu.pipeline_mode<synchronous>, transform_indices = @transform_3, window_bounds = array<i64: 16, 32>}, {transform_indices = @transform_4, window_bounds = array<i64: 1, 8, 128>}]} {
    %c0 = arith.constant 0 : index
    %c0_0 = arith.constant 0 : index
    %0 = vector.load %arg1[%c0, %c0_0] : memref<8x32xf32, #tpu.memory_space<vmem>>, vector<8x32xf32>
    %1 = arith.mulf %0, %0 : vector<8x32xf32>
    %cst = arith.constant dense<0.000000e+00> : vector<8xf32>
    %2 = vector.multi_reduction <add>, %1, %cst [1] : vector<8x32xf32> to vector<8xf32>
    %3 = vector.shape_cast %2 : vector<8xf32> to vector<8x1xf32>
    %cst_1 = arith.constant 1.000000e-24 : f32
    %4 = vector.broadcast %cst_1 : f32 to vector<8x1xf32>
    %5 = arith.maximumf %3, %4 : vector<8x1xf32>
    %6 = math.rsqrt %5 : vector<8x1xf32>
    %cst_2 = arith.constant 2.000000e+00 : f32
    %7 = vector.broadcast %cst_2 : f32 to vector<8x1xf32>
    %8 = arith.mulf %6, %7 : vector<8x1xf32>
    %9 = vector.broadcast %8 : vector<8x1xf32> to vector<8x32xf32>
    %10 = arith.mulf %0, %9 : vector<8x32xf32>
    %c0_3 = arith.constant 0 : index
    %c0_4 = arith.constant 0 : index
    %11 = vector.load %arg2[%c0_3, %c0_4] : memref<16x32xf32, #tpu.memory_space<vmem>>, vector<16x32xf32>
    %12 = arith.mulf %11, %11 : vector<16x32xf32>
    %cst_5 = arith.constant dense<0.000000e+00> : vector<16xf32>
    %13 = vector.multi_reduction <add>, %12, %cst_5 [1] : vector<16x32xf32> to vector<16xf32>
    %14 = vector.shape_cast %13 : vector<16xf32> to vector<16x1xf32>
    %cst_6 = arith.constant 1.000000e-24 : f32
    %15 = vector.broadcast %cst_6 : f32 to vector<16x1xf32>
    %16 = arith.maximumf %14, %15 : vector<16x1xf32>
    %17 = math.rsqrt %16 : vector<16x1xf32>
    %cst_7 = arith.constant 1.000000e+00 : f32
    %18 = vector.broadcast %cst_7 : f32 to vector<16x1xf32>
    %19 = arith.mulf %17, %18 : vector<16x1xf32>
    %20 = vector.broadcast %19 : vector<16x1xf32> to vector<16x32xf32>
    %21 = arith.mulf %11, %20 : vector<16x32xf32>
    %c0_8 = arith.constant 0 : index
    %c0_9 = arith.constant 0 : index
    %22 = vector.load %arg3[%c0_8, %c0_9] : memref<8x32xf32, #tpu.memory_space<vmem>>, vector<8x32xf32>
    %23 = arith.mulf %22, %22 : vector<8x32xf32>
    %cst_10 = arith.constant dense<0.000000e+00> : vector<8xf32>
    %24 = vector.multi_reduction <add>, %23, %cst_10 [1] : vector<8x32xf32> to vector<8xf32>
    %25 = vector.shape_cast %24 : vector<8xf32> to vector<8x1xf32>
    %cst_11 = arith.constant 1.000000e-24 : f32
    %26 = vector.broadcast %cst_11 : f32 to vector<8x1xf32>
    %27 = arith.maximumf %25, %26 : vector<8x1xf32>
    %28 = math.rsqrt %27 : vector<8x1xf32>
    %cst_12 = arith.constant 1.000000e+01 : f32
    %29 = vector.broadcast %cst_12 : f32 to vector<8x1xf32>
    %30 = arith.mulf %28, %29 : vector<8x1xf32>
    %31 = vector.broadcast %30 : vector<8x1xf32> to vector<8x32xf32>
    %32 = arith.mulf %22, %31 : vector<8x32xf32>
    %c0_13 = arith.constant 0 : index
    %c0_14 = arith.constant 0 : index
    %33 = vector.load %arg4[%c0_13, %c0_14] : memref<16x32xf32, #tpu.memory_space<vmem>>, vector<16x32xf32>
    %34 = arith.mulf %33, %33 : vector<16x32xf32>
    %cst_15 = arith.constant dense<0.000000e+00> : vector<16xf32>
    %35 = vector.multi_reduction <add>, %34, %cst_15 [1] : vector<16x32xf32> to vector<16xf32>
    %36 = vector.shape_cast %35 : vector<16xf32> to vector<16x1xf32>
    %cst_16 = arith.constant 1.000000e-24 : f32
    %37 = vector.broadcast %cst_16 : f32 to vector<16x1xf32>
    %38 = arith.maximumf %36, %37 : vector<16x1xf32>
    %39 = math.rsqrt %38 : vector<16x1xf32>
    %cst_17 = arith.constant 1.000000e+00 : f32
    %40 = vector.broadcast %cst_17 : f32 to vector<16x1xf32>
    %41 = arith.mulf %39, %40 : vector<16x1xf32>
    %42 = vector.broadcast %41 : vector<16x1xf32> to vector<16x32xf32>
    %43 = arith.mulf %33, %42 : vector<16x32xf32>
    %cst_18 = arith.constant dense<0.000000e+00> : vector<8x16xf32>
    %44 = tpu.matmul %10, %21, %cst_18 {dimension_numbers = #tpu.dot_dimension_numbers<[1], [1], [0], [0], [0, 0, 1, 0], [], []>} : vector<8x32xf32>, vector<16x32xf32>, vector<8x16xf32> -> vector<8x16xf32>
    %cst_19 = arith.constant dense<0.000000e+00> : vector<8x16xf32>
    %45 = tpu.matmul %32, %43, %cst_19 {dimension_numbers = #tpu.dot_dimension_numbers<[1], [1], [0], [0], [0, 0, 1, 0], [], []>} : vector<8x32xf32>, vector<16x32xf32>, vector<8x16xf32> -> vector<8x16xf32>
    %cst_20 = arith.constant dense<0xFF800000> : vector<8xf32>
    %46 = vector.multi_reduction <maximumf>, %44, %cst_20 [1] : vector<8x16xf32> to vector<8xf32>
    %47 = vector.shape_cast %46 : vector<8xf32> to vector<8x1xf32>
    %48 = vector.broadcast %47 : vector<8x1xf32> to vector<8x16xf32>
    %49 = arith.subf %44, %48 : vector<8x16xf32>
    %50 = math.exp %49 : vector<8x16xf32>
    %cst_21 = arith.constant dense<0.000000e+00> : vector<8xf32>
    %51 = vector.multi_reduction <add>, %50, %cst_21 [1] : vector<8x16xf32> to vector<8xf32>
    %52 = vector.shape_cast %51 : vector<8xf32> to vector<8x1xf32>
    %53 = math.log %52 : vector<8x1xf32>
    %54 = vector.broadcast %53 : vector<8x1xf32> to vector<8x16xf32>
    %55 = arith.subf %49, %54 : vector<8x16xf32>
    %cst_22 = arith.constant dense<0xFF800000> : vector<8xf32>
    %56 = vector.multi_reduction <maximumf>, %45, %cst_22 [1] : vector<8x16xf32> to vector<8xf32>
    %57 = vector.shape_cast %56 : vector<8xf32> to vector<8x1xf32>
    %58 = vector.broadcast %57 : vector<8x1xf32> to vector<8x16xf32>
    %59 = arith.subf %45, %58 : vector<8x16xf32>
    %60 = math.exp %59 : vector<8x16xf32>
    %cst_23 = arith.constant dense<0.000000e+00> : vector<8xf32>
    %61 = vector.multi_reduction <add>, %60, %cst_23 [1] : vector<8x16xf32> to vector<8xf32>
    %62 = vector.shape_cast %61 : vector<8xf32> to vector<8x1xf32>
    %63 = math.log %62 : vector<8x1xf32>
    %64 = vector.broadcast %63 : vector<8x1xf32> to vector<8x16xf32>
    %65 = arith.subf %59, %64 : vector<8x16xf32>
    %cst_24 = arith.constant 1.000000e+00 : f32
    %66 = vector.broadcast %cst_24 : f32 to vector<8x1xf32>
    %67 = arith.divf %66, %62 : vector<8x1xf32>
    %68 = vector.broadcast %67 : vector<8x1xf32> to vector<8x16xf32>
    %69 = arith.mulf %60, %68 : vector<8x16xf32>
    %70 = tpu.iota {dimensions = array<i32: 1>} : vector<8x16xi32>
    %71 = vector.broadcast %57 : vector<8x1xf32> to vector<8x16xf32>
    %72 = arith.cmpf oeq, %45, %71 : vector<8x16xf32>
    %c16_i32 = arith.constant 16 : i32
    %73 = vector.broadcast %c16_i32 : i32 to vector<8x16xi32>
    %74 = arith.select %72, %70, %73 : vector<8x16xi1>, vector<8x16xi32>
    %cst_25 = arith.constant dense<2147483647> : vector<8xi32>
    %75 = vector.multi_reduction <minsi>, %74, %cst_25 [1] : vector<8x16xi32> to vector<8xi32>
    %76 = vector.shape_cast %75 : vector<8xi32> to vector<8x1xi32>
    %77 = vector.broadcast %47 : vector<8x1xf32> to vector<8x16xf32>
    %78 = arith.cmpf oeq, %44, %77 : vector<8x16xf32>
    %c16_i32_26 = arith.constant 16 : i32
    %79 = vector.broadcast %c16_i32_26 : i32 to vector<8x16xi32>
    %80 = arith.select %78, %70, %79 : vector<8x16xi1>, vector<8x16xi32>
    %cst_27 = arith.constant dense<2147483647> : vector<8xi32>
    %81 = vector.multi_reduction <minsi>, %80, %cst_27 [1] : vector<8x16xi32> to vector<8xi32>
    %82 = vector.shape_cast %81 : vector<8xi32> to vector<8x1xi32>
    %83 = arith.subf %65, %55 : vector<8x16xf32>
    %84 = arith.mulf %69, %83 : vector<8x16xf32>
    %85 = vector.shape_cast %84 : vector<8x16xf32> to vector<1x8x16xf32>
    %cst_28 = arith.constant dense<0.000000e+00> : vector<1xf32>
    %86 = vector.multi_reduction <add>, %85, %cst_28 [1, 2] : vector<1x8x16xf32> to vector<1xf32>
    %87 = vector.shape_cast %86 : vector<1xf32> to vector<1x1x1xf32>
    %88 = vector.extract %87[0, 0, 0] : f32 from vector<1x1x1xf32>
    %89 = vector.broadcast %76 : vector<8x1xi32> to vector<8x16xi32>
    %90 = arith.cmpi eq, %70, %89 : vector<8x16xi32>
    %91 = arith.extui %90 : vector<8x16xi1> to vector<8x16xi32>
    %92 = arith.sitofp %91 : vector<8x16xi32> to vector<8x16xf32>
    %cst_29 = arith.constant 0.000000e+00 : f32
    %93 = vector.broadcast %cst_29 : f32 to vector<8x16xf32>
    %94 = arith.subf %93, %55 : vector<8x16xf32>
    %95 = arith.mulf %94, %92 : vector<8x16xf32>
    %96 = vector.shape_cast %95 : vector<8x16xf32> to vector<1x8x16xf32>
    %cst_30 = arith.constant dense<0.000000e+00> : vector<1xf32>
    %97 = vector.multi_reduction <add>, %96, %cst_30 [1, 2] : vector<1x8x16xf32> to vector<1xf32>
    %98 = vector.shape_cast %97 : vector<1xf32> to vector<1x1x1xf32>
    %99 = vector.extract %98[0, 0, 0] : f32 from vector<1x1x1xf32>
    %100 = arith.cmpi eq, %82, %76 : vector<8x1xi32>
    %101 = arith.extui %100 : vector<8x1xi1> to vector<8x1xi32>
    %102 = arith.sitofp %101 : vector<8x1xi32> to vector<8x1xf32>
    %103 = vector.shape_cast %102 : vector<8x1xf32> to vector<1x8x1xf32>
    %cst_31 = arith.constant dense<0.000000e+00> : vector<1xf32>
    %104 = vector.multi_reduction <add>, %103, %cst_31 [1, 2] : vector<1x8x1xf32> to vector<1xf32>
    %105 = vector.shape_cast %104 : vector<1xf32> to vector<1x1x1xf32>
    %106 = vector.extract %105[0, 0, 0] : f32 from vector<1x1x1xf32>
    %107 = tpu.iota {dimensions = array<i32: 1>} : vector<1x8x128xi32>
    %108 = tpu.iota {dimensions = array<i32: 2>} : vector<1x8x128xi32>
    %c0_i32 = arith.constant 0 : i32
    %109 = vector.broadcast %c0_i32 : i32 to vector<1x8x128xi32>
    %110 = arith.cmpi eq, %107, %109 : vector<1x8x128xi32>
    %c0_i32_32 = arith.constant 0 : i32
    %111 = vector.broadcast %c0_i32_32 : i32 to vector<1x8x128xi32>
    %112 = arith.cmpi eq, %108, %111 : vector<1x8x128xi32>
    %113 = arith.andi %110, %112 : vector<1x8x128xi1>
    %cst_33 = arith.constant 0.000000e+00 : f32
    %114 = vector.broadcast %88 : f32 to vector<1x8x128xf32>
    %115 = vector.broadcast %cst_33 : f32 to vector<1x8x128xf32>
    %116 = arith.select %113, %114, %115 : vector<1x8x128xi1>, vector<1x8x128xf32>
    %c0_i32_34 = arith.constant 0 : i32
    %117 = vector.broadcast %c0_i32_34 : i32 to vector<1x8x128xi32>
    %118 = arith.cmpi eq, %107, %117 : vector<1x8x128xi32>
    %c1_i32 = arith.constant 1 : i32
    %119 = vector.broadcast %c1_i32 : i32 to vector<1x8x128xi32>
    %120 = arith.cmpi eq, %108, %119 : vector<1x8x128xi32>
    %121 = arith.andi %118, %120 : vector<1x8x128xi1>
    %122 = vector.broadcast %99 : f32 to vector<1x8x128xf32>
    %123 = arith.select %121, %122, %116 : vector<1x8x128xi1>, vector<1x8x128xf32>
    %c0_i32_35 = arith.constant 0 : i32
    %124 = vector.broadcast %c0_i32_35 : i32 to vector<1x8x128xi32>
    %125 = arith.cmpi eq, %107, %124 : vector<1x8x128xi32>
    %c2_i32 = arith.constant 2 : i32
    %126 = vector.broadcast %c2_i32 : i32 to vector<1x8x128xi32>
    %127 = arith.cmpi eq, %108, %126 : vector<1x8x128xi32>
    %128 = arith.andi %125, %127 : vector<1x8x128xi1>
    %129 = vector.broadcast %106 : f32 to vector<1x8x128xf32>
    %130 = arith.select %128, %129, %123 : vector<1x8x128xi1>, vector<1x8x128xf32>
    %c0_36 = arith.constant 0 : index
    %c0_37 = arith.constant 0 : index
    %c0_38 = arith.constant 0 : index
    %131 = vector.load %arg5[%c0_36, %c0_37, %c0_38] : memref<1x8x128xf32, #tpu.memory_space<vmem>>, vector<1x8x128xf32>
    tpu.vector_store %arg5[%c0_36, %c0_37, %c0_38], %130 {strides = array<i32>} : memref<1x8x128xf32, #tpu.memory_space<vmem>>, vector<1x8x128xf32>,
    return
  }
  func.func @transform_0(%arg0: i32) -> (i32, i32) {
    %c0_i32 = arith.constant 0 : i32
    %c0_i32_0 = arith.constant 0 : i32
    return %arg0, %c0_i32 : i32, i32
  }
  func.func @transform_1(%arg0: i32) -> (i32, i32) {
    %c0_i32 = arith.constant 0 : i32
    %c0_i32_0 = arith.constant 0 : i32
    %c0_i32_1 = arith.constant 0 : i32
    return %c0_i32, %c0_i32_0 : i32, i32
  }
  func.func @transform_2(%arg0: i32) -> (i32, i32) {
    %c0_i32 = arith.constant 0 : i32
    %c0_i32_0 = arith.constant 0 : i32
    return %arg0, %c0_i32 : i32, i32
  }
  func.func @transform_3(%arg0: i32) -> (i32, i32) {
    %c0_i32 = arith.constant 0 : i32
    %c0_i32_0 = arith.constant 0 : i32
    %c0_i32_1 = arith.constant 0 : i32
    return %c0_i32, %c0_i32_0 : i32, i32
  }
  func.func @transform_4(%arg0: i32) -> (i32, i32, i32) {
    %c0_i32 = arith.constant 0 : i32
    %c0_i32_0 = arith.constant 0 : i32
    %c0_i32_1 = arith.constant 0 : i32
    return %arg0, %c0_i32, %c0_i32_0 : i32, i32, i32
  }
}

</mosaic_0001>

<bundles_post_ra>
// kernel: tpu_custom_call.1
= control target key start
LH: loop header
LB: loop body
LE: loop exit
PB: predicated region body
PF: predicated region fallthrough
CT: control target
= control target key end

     0   :  { %9 = vsyncpa [#allocation3], 0  ;;  %s682_s0 = inlined_call_operand.hbm [shape: f32[8,32], index: 0, kind: input, shape index: {}]   ;;  %s683_s1 = inlined_call_operand.hbm [shape: f32[16,32], index: 1, kind: input, shape index: {}]   ;;  %s684_s2 = inlined_call_operand.hbm [shape: f32[8,32], index: 2, kind: input, shape index: {}]   ;;  %s685_s3 = inlined_call_operand.hbm [shape: f32[16,32], index: 3, kind: input, shape index: {}]   ;;  %s686_s4 = inlined_call_operand.hbm [shape: f32[1,8,128], index: 4, kind: output, shape index: {}]  }
   0x1   :  { %10 = vsyncpa [#allocation6], 0 }
   0x2   :  { %11 = vsyncpa [#allocation9], 0 }
   0x3   :  { %12 = vsyncpa [#allocation4], 0  ;;  %s589_s15 = smov [#allocation5]  }
   0x4   :  { %s28_s16 = sshll.u32 %s589_s15, 4  ;;  %s29_s16 = int_to_ptr.vmem [resolvable:$true] %s28_s16 }
   0x5   :  { %s489_s17 = scalar_lea.vmem %s29_s16, 256  ;;  %p494_p1 = scmp.lt.s32.totalorder %s29_s16, %s29_s16 }
   0x6   :  { %p490_p0 = scmp.ne.s32.totalorder %s29_s16, %s489_s17  ;;  %p495_p2 = scmp.lt.s32.totalorder %s489_s17, %s489_s17 }
   0x8   :  { %p496_p3 = por %p495_p2, %p494_p1 }
   0xa   :  { %p497_p4 = pnand %p496_p3, %p490_p0 }
   0xc   :  { %500 = shalt.err (!%p497_p4)
}
   0xd   :  { %s590_s18 = smov 128   ;;  %s591_s19 = smov 8  }
   0xe   :  { %34 = dma.hbm_to_vmem [thread:$0]  %s683_s1, 256, %s29_s16, [#allocation6], %s590_s18, %s590_s18, %s591_s19  }
   0xf   :  { %s592_s22 = smov [#allocation2]   ;;  %s593_s24 = smov [#allocation7]  }
  0x10   :  { %s19_s23 = sshll.u32 %s592_s22, 4  ;;  %s41_s25 = sshll.u32 %s593_s24, 4  ;;  %s20_s23 = int_to_ptr.vmem [resolvable:$true] %s19_s23  ;;  %s42_s25 = int_to_ptr.vmem [resolvable:$true] %s41_s25 }
  0x11   :  { %s509_s26 = scalar_lea.vmem %s20_s23, 128  ;;  %p514_p6 = scmp.lt.s32.totalorder %s20_s23, %s20_s23 }
  0x12   :  { %p510_p5 = scmp.ne.s32.totalorder %s20_s23, %s509_s26  ;;  %p515_p7 = scmp.lt.s32.totalorder %s509_s26, %s509_s26 }
  0x14   :  { %p516_p8 = por %p515_p7, %p514_p6 }
  0x16   :  { %p517_p9 = pnand %p516_p8, %p510_p5 }
  0x18   :  { %520 = shalt.err (!%p517_p9)
}
  0x19   :  { %22 = dma.hbm_to_vmem [thread:$0]  %s682_s0, 128, %s20_s23, [#allocation3]  }
  0x1a   :  { %s529_s29 = scalar_lea.vmem %s42_s25, 128  ;;  %p534_p11 = scmp.lt.s32.totalorder %s42_s25, %s42_s25 }
  0x1b   :  { %p530_p10 = scmp.ne.s32.totalorder %s42_s25, %s529_s29  ;;  %p535_p12 = scmp.lt.s32.totalorder %s529_s29, %s529_s29 }
  0x1d   :  { %p536_p13 = por %p535_p12, %p534_p11 }
  0x1f   :  { %p537_p0 = pnand %p536_p13, %p530_p10 }
  0x21   :  { %540 = shalt.err (!%p537_p0)
}
  0x22   :  { %44 = dma.hbm_to_vmem [thread:$0]  %s684_s2, 128, %s42_s25, [#allocation6]  }
  0x23   :  { %s594_s5 = smov [#allocation8]  }
  0x24   :  { %s50_s6 = sshll.u32 %s594_s5, 4  ;;  %s51_s6 = int_to_ptr.vmem [resolvable:$true] %s50_s6 }
  0x25   :  { %s549_s7 = scalar_lea.vmem %s51_s6, 256  ;;  %p554_p2 = scmp.lt.s32.totalorder %s51_s6, %s51_s6 }
  0x26   :  { %p550_p1 = scmp.ne.s32.totalorder %s51_s6, %s549_s7  ;;  %p555_p3 = scmp.lt.s32.totalorder %s549_s7, %s549_s7 }
  0x28   :  { %p556_p4 = por %p555_p3, %p554_p2 }
  0x2a   :  { %p557_p5 = pnand %p556_p4, %p550_p1 }
  0x2c   :  { %560 = shalt.err (!%p557_p5)
}
  0x2d   :  { %56 = dma.hbm_to_vmem [thread:$0]  %s685_s3, 256, %s51_s6, [#allocation9], %s590_s18, %s590_s18, %s591_s19  }
  0x2e   :  { %581 = dma.done.wait [#allocation3], 128  }
  0x2f   :  { %582 = vsyncadd [#allocation3], 4294967168 }
  0x30   :  { %583 = dma.done.wait [#allocation6], 384  }
  0x31   :  { %584 = vsyncadd [#allocation6], 4294966912 }
  0x32   :  { %585 = dma.done.wait [#allocation9], 256  }
  0x33   :  { %586 = vsyncadd [#allocation9], 4294967040  ;;  %vm71_vm0 = vcmask 261120   ;;  %v105_v0 = vld [vmem:[#allocation8 + $0x8] sm:$0xff]  ;;  %v104_v1 = vld [vmem:[#allocation8] sm:$0xff]  ;;  %v595_v18 = vmov 0.0   ;;  %v306_v51 = vlaneseq }
  0x34   :  { %v80_v2 = vld [vmem:[#allocation5 + $0x8] sm:$0xff]  ;;  %v107_v3 = vmul.f32 %v105_v0, %v105_v0  ;;  %v106_v4 = vmul.f32 %v104_v1, %v104_v1  ;;  %v95_v6 = vld [vmem:[#allocation7] sm:$0xff]  ;;  %v79_v8 = vld [vmem:[#allocation5] sm:$0xff]  ;;  %437 = vmatprep.subr.mxu1 %v595_v18  ;;  %430 = vmatprep.subr.mxu0 %v595_v18  ;;  %vm596_vm1 = vmmov 0   ;;  %vm278_vm2 = vcmask 130048   ;;  %s597_s9 = smov [#allocation10]  }
  0x35   :  { %v82_v5 = vmul.f32 %v80_v2, %v80_v2  ;;  %v96_v7 = vmul.f32 %v95_v6, %v95_v6  ;;  %v69_v9 = vld [vmem:[#allocation2] sm:$0xff]  ;;  %v81_v14 = vmul.f32 %v79_v8, %v79_v8  ;;  %441 = vmatprep.mubr.msk.f32.mxu1 %vm596_vm1, %v595_v18  ;;  %434 = vmatprep.mubr.msk.f32.mxu0 %vm596_vm1, %v595_v18  ;;  %v662_v52 = vand.u32 127, %v306_v51  ;;  %s405_s10 = sshll.u32 %s597_s9, 4  ;;  %s406_s10 = int_to_ptr.vmem [resolvable:$true] %s405_s10 }
  0x36   :  { %v111_v10 = vsel %vm71_vm0, %v107_v3, 0.0  ;;  %v108_v11 = vsel %vm71_vm0, %v106_v4, 0.0  ;;  %v70_v15 = vmul.f32 %v69_v9, %v69_v9  ;;  %vm372_vm8 = vcmask 7168   ;;  %s561_s12 = scalar_lea.vmem %s406_s10, 128  ;;  %p566_p7 = scmp.lt.s32.totalorder %s406_s10, %s406_s10 }
  0x37   :  { %112 = vadd.xlane.f32.xlu0 %v111_v10  ;;  %109 = vadd.xlane.f32.xlu1 %v108_v11  ;;  %v86_v12 = vsel %vm71_vm0, %v82_v5, 0.0  ;;  %v97_v13 = vsel %vm71_vm0, %v96_v7, 0.0  ;;  %v83_v16 = vsel %vm71_vm0, %v81_v14, 0.0  ;;  %vm386_vm11 = vcmp.eq.s32.totalorder %v662_v52, 0  ;;  %p562_p6 = scmp.ne.s32.totalorder %s406_s10, %s561_s12  ;;  %p567_p8 = scmp.lt.s32.totalorder %s561_s12, %s561_s12 }
  0x38   :  { %v72_v17 = vsel %vm71_vm0, %v70_v15, 0.0  ;;  %vm390_vm12 = vcmp.eq.s32.totalorder %v662_v52, 1  ;;  %vm394_vm14 = vcmp.eq.s32.totalorder %v662_v52, 2 }
  0x39   :  { %p568_p9 = por %p567_p8, %p566_p7 }
  0x3b   :  { %87 = vadd.xlane.f32.xlu0 %v86_v12  ;;  %98 = vadd.xlane.f32.xlu1 %v97_v13  ;;  %p569_p10 = pnand %p568_p9, %p562_p6 }
  0x3f   :  { %84 = vadd.xlane.f32.xlu0 %v83_v16  ;;  %73 = vadd.xlane.f32.xlu1 %v72_v17 }
  0xc0   :  { %v113_v19 = vpop.xlane.xlu0 %112  ;;  %v110_v20 = vpop.xlane.xlu1 %109 }
  0xc1   :  { %v115_v21 = vmax.f32 %v113_v19, 1e-24  ;;  %v114_v22 = vmax.f32 %v110_v20, 1e-24 }
  0xc3   :  { %459 = vrsqrt.f32 %v115_v21 }
  0xc4   :  { %v88_v23 = vpop.xlane.xlu0 %87  ;;  %v99_v24 = vpop.xlane.xlu1 %98  ;;  %461 = vrsqrt.f32 %v114_v22 }
  0xc5   :  { %v90_v25 = vmax.f32 %v88_v23, 1e-24  ;;  %v100_v26 = vmax.f32 %v99_v24, 1e-24 }
  0xc7   :  { %463 = vrsqrt.f32 %v90_v25 }
  0xc8   :  { %465 = vrsqrt.f32 %v100_v26  ;;  %v85_v27 = vpop.xlane.xlu0 %84  ;;  %v74_v28 = vpop.xlane.xlu1 %73 }
  0xc9   :  { %v89_v29 = vmax.f32 %v85_v27, 1e-24  ;;  %v75_v30 = vmax.f32 %v74_v28, 1e-24 }
  0xcb   :  { %467 = vrsqrt.f32 %v89_v29 }
  0xcc   :  { %469 = vrsqrt.f32 %v75_v30 }
  0xd0   :  { %v460_v31 = vpop.eup %459 }
  0xd1   :  { %v119_v32 = vmul.f32 %v460_v31, %v105_v0  ;;  %v462_v33 = vpop.eup %461 }
  0xd2   :  { %v118_v37 = vmul.f32 %v462_v33, %v104_v1 }
  0xd3   :  { %438 = vmatpush3.xpose.msk.msra.mxu1 %vm71_vm0, %v119_v32 }
  0xd4   :  { %v464_v34 = vpop.eup %463  ;;  %439 = vmatprep.subr.mxu1 %v595_v18 }
  0xd5   :  { %v466_v35 = vpop.eup %465  ;;  %v94_v36 = vmul.f32 %v464_v34, %v80_v2 }
  0xd6   :  { %v102_v38 = vmul.f32 10.0, %v466_v35 }
  0xd7   :  { %431 = vmatpush3.xpose.msk.msra.mxu0 %vm71_vm0, %v94_v36  ;;  %440 = vmatpush3.xpose.msk.msra.mxu1 %vm71_vm0, %v118_v37 }
  0xd8   :  { %v468_v39 = vpop.eup %467  ;;  %v103_v40 = vmul.f32 %v102_v38, %v95_v6  ;;  %432 = vmatprep.subr.mxu0 %v595_v18 }
  0xd9   :  { %v470_v41 = vpop.eup %469  ;;  %v93_v42 = vmul.f32 %v468_v39, %v79_v8 }
  0xda   :  { %v77_v43 = vmul.f32 2.0, %v470_v41  ;;  %442 = vmatmul.mubr.msk.f32.vlgmr.msra.gmra.mxu1 %vm71_vm0, %v103_v40 }
  0xdb   :  { %433 = vmatpush3.xpose.msk.msra.mxu0 %vm71_vm0, %v93_v42 }
  0xdc   :  { %v78_v44 = vmul.f32 %v77_v43, %v69_v9 }
  0xde   :  { %435 = vmatmul.mubr.msk.f32.vlgmr.msra.gmra.mxu0 %vm71_vm0, %v78_v44 }
 0x19a   :  { %v274_v45 = vpop.f32.mrf.mxu1 }
 0x19b   :  { %v291_v46 = vsel %vm278_vm2, %v274_v45, -inf }
 0x19c   :  { %v443_v47 = vpop.f32.mrf.mxu1  ;;  %292 = vmax.xlane.f32.xlu0 %v291_v46 }
 0x19e   :  { %v195_v48 = vpop.f32.mrf.mxu0 }
 0x19f   :  { %v279_v49 = vsel %vm278_vm2, %v195_v48, -inf }
 0x1a0   :  { %280 = vmax.xlane.f32.xlu1 %v279_v49  ;;  %v436_v50 = vpop.f32.mrf.mxu0 }
 0x225   :  { %v293_v53 = vpop.xlane.xlu0 %292 }
 0x226   :  { %v294_v54 = vsub.f32 %v274_v45, %v293_v53  ;;  %vm308_vm3 = vcmp.eq.f32.partialorder %v274_v45, %v293_v53 }
 0x227   :  { %v309_v55 = vsel %vm308_vm3, %v662_v52, 16 }
 0x228   :  { %v295_v56 = vmul.f32 1.442695, %v294_v54  ;;  %v310_v57 = vsel %vm278_vm2, %v309_v55, 2147483647 }
 0x229   :  { %v281_v58 = vpop.xlane.xlu1 %280  ;;  %v312_v59 = vshra.s32 %v310_v57, 16  ;;  %v311_v7 = vand.u32 65535, %v310_v57 }
 0x22a   :  { %471 = vpow2.f32 %v295_v56  ;;  %v282_v60 = vsub.f32 %v195_v48, %v281_v58  ;;  %vm325_vm4 = vcmp.eq.f32.partialorder %v195_v48, %v281_v58 }
 0x22b   :  { %v326_v61 = vsel %vm325_vm4, %v662_v52, 16  ;;  %v314_v62 = vcvt.s32.f32 %v312_v59  ;;  %v313_v9 = vcvt.s32.f32 %v311_v7 }
 0x22c   :  { %v283_v63 = vmul.f32 1.442695, %v282_v60  ;;  %v327_v0 = vsel %vm278_vm2, %v326_v61, 2147483647 }
 0x22d   :  { %315 = vmin.xlane.f32.xlu0 %v314_v62  ;;  %v329_v1 = vshra.s32 %v327_v0, 16  ;;  %v328_v10 = vand.u32 65535, %v327_v0 }
 0x22e   :  { %473 = vpow2.f32 %v283_v63 }
 0x22f   :  { %v331_v2 = vcvt.s32.f32 %v329_v1  ;;  %v330_v13 = vcvt.s32.f32 %v328_v10 }
 0x231   :  { %332 = vmin.xlane.f32.xlu1 %v331_v2 }
 0x237   :  { %v472_v3 = vpop.eup %471 }
 0x238   :  { %v297_v4 = vsel %vm278_vm2, %v472_v3, 0.0 }
 0x239   :  { %298 = vadd.xlane.f32.xlu1 %v297_v4 }
 0x23b   :  { %v474_v5 = vpop.eup %473 }
 0x23c   :  { %v285_v6 = vsel %vm278_vm2, %v474_v5, 0.0 }
 0x23d   :  { %286 = vadd.xlane.f32.xlu0 %v285_v6 }
 0x2b6   :  { %v316_v8 = vpop.xlane.xlu0 %315 }
 0x2b7   :  { %vm317_vm5 = vcmp.eq.f32.partialorder %v314_v62, %v316_v8  ;;  %v322_v29 = vcvt.f32.s32 %v316_v8 }
 0x2b8   :  { %v318_v11 = vsel %vm317_vm5, %v313_v9, inf }
 0x2b9   :  { %319 = vmin.xlane.f32.xlu0 %v318_v11  ;;  %v323_v31 = vshll.u32 %v322_v29, 16 }
 0x2ba   :  { %v333_v12 = vpop.xlane.xlu1 %332 }
 0x2bb   :  { %vm334_vm6 = vcmp.eq.f32.partialorder %v331_v2, %v333_v12  ;;  %v339_v32 = vcvt.f32.s32 %v333_v12 }
 0x2bc   :  { %v335_v14 = vsel %vm334_vm6, %v330_v13, inf }
 0x2bd   :  { %336 = vmin.xlane.f32.xlu1 %v335_v14  ;;  %v340_v36 = vshll.u32 %v339_v32, 16 }
 0x2c2   :  { %v299_v15 = vpop.xlane.xlu1 %298 }
 0x2c3   :  { %475 = vlog2.f32 %v299_v15 }
 0x2c6   :  { %v287_v16 = vpop.xlane.xlu0 %286 }
 0x2c7   :  { %477 = vlog2.f32 %v287_v16 }
 0x2c8   :  { %479 = vrcp.f32 %v299_v15 }
 0x2d0   :  { %v476_v17 = vpop.eup %475 }
 0x2d1   :  { %v301_v19 = vmul.f32 0.6931472, %v476_v17 }
 0x2d3   :  { %v302_v24 = vsub.f32 %v294_v54, %v301_v19 }
 0x2d4   :  { %v478_v20 = vpop.eup %477 }
 0x2d5   :  { %v289_v21 = vmul.f32 0.6931472, %v478_v20  ;;  %v480_v22 = vpop.eup %479 }
 0x2d6   :  { %v305_v25 = vmul.f32 %v480_v22, %v472_v3  ;;  %v384_v3 = vshrl.u32 %v306_v51, 7 }
 0x2d7   :  { %v290_v23 = vsub.f32 %v282_v60, %v289_v21 }
 0x2d8   :  { %vm385_vm10 = vcmp.eq.s32.totalorder %v384_v3, 0 }
 0x2d9   :  { %v342_v26 = vsub.f32 %v302_v24, %v290_v23  ;;  %v357_v38 = vsub.f32 0.0, %v290_v23  ;;  %vm387_vm13 = vmand %vm385_vm10, %vm386_vm11 }
 0x2da   :  { %vm391_vm15 = vmand %vm385_vm10, %vm390_vm12 }
 0x2db   :  { %v343_v27 = vmul.f32 %v342_v26, %v305_v25  ;;  %vm395_vm0 = vmand %vm385_vm10, %vm394_vm14 }
 0x2dd   :  { %v344_v28 = vsel %vm278_vm2, %v343_v27, 0.0 }
 0x2de   :  { %345 = vadd.xlane.f32.xlu0 %v344_v28 }
 0x342   :  { %v320_v30 = vpop.xlane.xlu0 %319 }
 0x343   :  { %v321_v33 = vcvt.f32.s32 %v320_v30 }
 0x345   :  { %v324_v34 = vadd.s32 %v323_v31, %v321_v33 }
 0x346   :  { %v337_v35 = vpop.xlane.xlu1 %336 }
 0x347   :  { %v338_v37 = vcvt.f32.s32 %v337_v35  ;;  %vm354_vm7 = vcmp.eq.s32.totalorder %v662_v52, %v324_v34 }
 0x348   :  { %v422_v39 = vsel %vm354_vm7, 1.0, %v595_v18 }
 0x349   :  { %v341_v40 = vadd.s32 %v340_v36, %v338_v37  ;;  %v358_v41 = vmul.f32 %v422_v39, %v357_v38 }
 0x34b   :  { %v359_v42 = vsel %vm278_vm2, %v358_v41, 0.0  ;;  %vm369_vm9 = vcmp.eq.s32.totalorder %v341_v40, %v324_v34 }
 0x34c   :  { %360 = vadd.xlane.f32.xlu1 %v359_v42  ;;  %v423_v43 = vsel %vm369_vm9, 1.0, %v595_v18 }
 0x34d   :  { %v373_v44 = vsel %vm372_vm8, %v423_v43, 0.0 }
 0x34e   :  { %374 = vadd.xlane.f32.xlu0 %v373_v44 }
 0x367   :  { %v346_v45 = vpop.xlane.xlu0 %345 }
 0x368   :  { %v347_v46 = vrot.slane %v346_v45, 4 }
 0x36a   :  { %v348_v47 = vadd.f32 %v347_v46, %v346_v45 }
 0x36c   :  { %v349_v48 = vrot.slane %v348_v47, 2 }
 0x36e   :  { %v350_v49 = vadd.f32 %v349_v48, %v348_v47 }
 0x370   :  { %v351_v50 = vrot.slane %v350_v49, 1 }
 0x372   :  { %v352_v53 = vadd.f32 %v351_v50, %v350_v49 }
 0x374   :  { %444 = vpush %v352_v53 }
 0x3a5   :  { %s445_s2 = spop %444 }
 0x3a6   :  { %v388_v4 = vstv %s445_s2 }
 0x3a7   :  { %v389_v5 = vsel %vm387_vm13, %v388_v4, 0.0 }
 0x3d5   :  { %v361_v54 = vpop.xlane.xlu1 %360 }
 0x3d6   :  { %v362_v55 = vrot.slane %v361_v54, 4 }
 0x3d7   :  { %v375_v56 = vpop.xlane.xlu0 %374 }
 0x3d8   :  { %v363_v57 = vadd.f32 %v362_v55, %v361_v54  ;;  %v376_v58 = vrot.slane %v375_v56, 4 }
 0x3da   :  { %v364_v59 = vrot.slane %v363_v57, 2  ;;  %v377_v60 = vadd.f32 %v376_v58, %v375_v56 }
 0x3dc   :  { %v365_v61 = vadd.f32 %v364_v59, %v363_v57  ;;  %v378_v62 = vrot.slane %v377_v60, 2 }
 0x3de   :  { %v379_v18 = vadd.f32 %v378_v62, %v377_v60  ;;  %v366_v63 = vrot.slane %v365_v61, 1 }
 0x3e0   :  { %v367_v0 = vadd.f32 %v366_v63, %v365_v61  ;;  %v380_v1 = vrot.slane %v379_v18, 1 }
 0x3e2   :  { %446 = vpush %v367_v0  ;;  %v381_v2 = vadd.f32 %v380_v1, %v379_v18 }
 0x3e4   :  { %448 = vpush %v381_v2 }
 0x413   :  { %s447_s3 = spop %446 }
 0x414   :  { %v392_v6 = vstv %s447_s3 }
 0x415   :  { %v393_v7 = vsel %vm391_vm15, %v392_v6, %v389_v5  ;;  %s449_s11 = spop %448 }
 0x416   :  { %v396_v51 = vstv %s449_s11 }
 0x417   :  { %v397_v8 = vsel %vm395_vm0, %v396_v51, %v393_v7 }
 0x418   :  { %398 = vst [vmem:[#allocation10] sm:$0xff] %v397_v8 }
 0x419   :  { %572 = shalt.err (!%p569_p10)
}
 0x41a   :  { %408 = dma.vmem_to_hbm [thread:$0]  %s406_s10, 128, %s686_s4, [#allocation4]  }
 0x41b   :  { %587 = dma.done.wait [#allocation4], 128  }
 0x41c   :  { %588 = vsyncadd [#allocation4], 4294967168 }
 0x41d   :  { %412 = vsyncpa [#allocation3], 1 }
 0x41e   :  { %413 = vsyncpa [#allocation6], 1 }
 0x41f   :  { %414 = vsyncpa [#allocation9], 1 }
 0x420   :  { %415 = vsyncpa [#allocation4], 1 }

</bundles_post_ra>
